<compile_context>
chip_gen: v5e
topology: v5e:2x2
jax: 0.10.0
libtpu: 0.0.40
codegen_flags: <defaults>
</compile_context>

<pallas_src>
from functools import partial

import jax
import jax.numpy as jnp
from jax import lax
from jax.experimental import pallas as pl
from jax.experimental.pallas import tpu as pltpu


def _round_up(x, m):
    return ((x + m - 1) // m) * m


# ----------------------------------------------------------------------------
# Pallas kernel: one grid step processes one time chunk; neuron state persists
# in VMEM scratch across grid steps.
# ----------------------------------------------------------------------------
def _ahpc_chunk_kernel(
    params_ref,   # SMEM f32[6]: beta1, thr1, beta_r, thr_r, beta2, thr2
    x_ref,        # VMEM (Tc*Bp, F)  bf16   input chunk (time-major, flattened)
    w1_ref,       # VMEM (F, H1)     bf16   quantized linear1 weight (in, out)
    w2_ref,       # VMEM (H1, H2)    bf16   quantized linear2 weight
    wcat_ref,     # VMEM (H2, H2p+Op) bf16  [w_rec_in | w3], each lane-padded
    wro_ref,      # VMEM (H2, H2)    bf16   recurrent output_dense weight
    out_ref,      # VMEM (Tc, Bp, O) f32    spike record chunk
    cur1_scr,     # VMEM (Tc*Bp, H1) f32    per-chunk linear1 currents
    mem1_scr,     # VMEM (Bp, H1) f32       leaky1 membrane      (persistent)
    memr_scr,     # VMEM (Bp, H2) f32       recurrent membrane   (persistent)
    spkp_scr,     # VMEM (Bp, H2) f32       recurrent prev spike (persistent)
    mem2_scr,     # VMEM (Bp, O)  f32       leaky2 membrane      (persistent)
    fb_scr,       # VMEM (Bp, H2) f32       pipelined feedback   (persistent)
):
    beta1 = params_ref[0]
    thr1 = params_ref[1]
    beta_r = params_ref[2]
    thr_r = params_ref[3]
    beta2 = params_ref[4]
    thr2 = params_ref[5]

    tc, bp, num_out = out_ref.shape
    h2 = w2_ref.shape[1]
    o_pad = _round_up(num_out, 128)
    h2_pad = wcat_ref.shape[1] - o_pad

    # ---- reset all persistent state on the first chunk only ----------------
    @pl.when(pl.program_id(0) == 0)
    def _init():
        mem1_scr[...] = jnp.zeros_like(mem1_scr)
        memr_scr[...] = jnp.zeros_like(memr_scr)
        spkp_scr[...] = jnp.zeros_like(spkp_scr)
        mem2_scr[...] = jnp.zeros_like(mem2_scr)
        fb_scr[...] = jnp.zeros_like(fb_scr)

    # ---- linear1 for the whole chunk: one (Tc*Bp, F) @ (F, H1) MXU matmul --
    # State-independent, so it is hoisted out of the recurrence; cur1 never
    # touches HBM.
    cur1_scr[...] = jnp.dot(
        x_ref[...], w1_ref[...], preferred_element_type=jnp.float32
    )

    def step(t, carry):
        mem1, memr, spk_prev, mem2, fb = carry

        # ---- leaky1 ---------------------------------------------------------
        row = pl.multiple_of(t * bp, 8)                 # Bp is a multiple of 8
        cur1 = cur1_scr[pl.ds(row, bp), :]              # (Bp, H1) f32
        m1 = beta1 * mem1 + cur1
        s1 = m1 > thr1
        mem1 = jnp.where(s1, 0.0, m1)                   # zero reset, no delay
        s1_bf = s1.astype(jnp.bfloat16)                 # 0/1 exact in bf16

        # ---- linear2 (first_dropout == identity at inference) ---------------
        cur2 = jnp.dot(s1_bf, w2_ref[...], preferred_element_type=jnp.float32)

        # ---- recurrent AHPC block (approximated, see header TODO) -----------
        # `fb` was produced at the end of the previous step from spk_prev.
        base = beta_r * memr + cur2 + fb
        mr = base * (1.0 - spk_prev)                    # delayed zero reset
        sr = mr > thr_r
        sr_bf = sr.astype(jnp.bfloat16)

        # ---- fused [recurrent input_dense | linear3]: one matmul, shared LHS
        combo = jnp.dot(sr_bf, wcat_ref[...],
                        preferred_element_type=jnp.float32)
        fb_pre = combo[:, :h2]                          # recurrent input_dense
        cur3 = combo[:, h2_pad:h2_pad + num_out]        # linear3 (tile-aligned)

        # ---- leaky2 (second_dropout == identity) ----------------------------
        m2 = beta2 * mem2 + cur3
        s2 = m2 > thr2
        mem2 = jnp.where(s2, 0.0, m2)
        out_ref[t] = s2.astype(jnp.float32)

        # ---- feedback for the NEXT step (off this step's serial tail) -------
        fb_next = jnp.dot(jnp.maximum(fb_pre, 0.0).astype(jnp.bfloat16),
                          wro_ref[...], preferred_element_type=jnp.float32)

        return (mem1, mr, sr.astype(jnp.float32), mem2, fb_next)

    init = (mem1_scr[...], memr_scr[...], spkp_scr[...],
            mem2_scr[...], fb_scr[...])
    unroll = 4 if tc % 4 == 0 else (2 if tc % 2 == 0 else 1)
    mem1, memr, spkp, mem2, fb = lax.fori_loop(0, tc, step, init,
                                               unroll=unroll)

    # ---- persist state for the next chunk ----------------------------------
    mem1_scr[...] = mem1
    memr_scr[...] = memr
    spkp_scr[...] = spkp
    mem2_scr[...] = mem2
    fb_scr[...] = fb


# ----------------------------------------------------------------------------
# Parameter prep (runs ONCE, not in the per-call hot path).
# ----------------------------------------------------------------------------
def _fake_quant_int8(w):
    """Brevitas-style per-tensor int8 fake-quant, narrow range [-127, 127]."""
    scale = jnp.maximum(jnp.max(jnp.abs(w)), 1e-8) / 127.0
    q = jnp.clip(jnp.round(w / scale), -127.0, 127.0)
    return q * scale


def prepare_weights(weights):
    """Fake-quantize once, cast to bf16, and build the fused [w_rec_in | w3]
    weight (each half padded to a 128-lane multiple so in-kernel slices are
    tile-aligned)."""
    w1, w2, wri, wro, w3 = weights
    w1q = _fake_quant_int8(w1).astype(jnp.bfloat16)
    w2q = _fake_quant_int8(w2).astype(jnp.bfloat16)
    wriq = _fake_quant_int8(wri).astype(jnp.bfloat16)
    wroq = _fake_quant_int8(wro).astype(jnp.bfloat16)
    w3q = _fake_quant_int8(w3).astype(jnp.bfloat16)

    h2 = wriq.shape[1]
    o = w3q.shape[1]
    h2_pad = _round_up(h2, 128)
    o_pad = _round_up(o, 128)
    wcat = jnp.concatenate(
        [jnp.pad(wriq, ((0, 0), (0, h2_pad - h2))),
         jnp.pad(w3q, ((0, 0), (0, o_pad - o)))],
        axis=1,
    )
    return w1q, w2q, wcat, wroq


# ----------------------------------------------------------------------------
# Forward pass.
# ----------------------------------------------------------------------------
@partial(jax.jit, static_argnames=("num_outputs", "time_chunk"))
def quant_ahpc_forward(x, w1q, w2q, wcatq, wroq, scalars, *,
                       num_outputs, time_chunk=4):
    """x: [B, T, F] (time_dim=1); returns spike record [T, B, num_outputs]
    (matches torch.stack over time)."""
    b, t_len, f = x.shape
    h1 = w1q.shape[1]
    h2 = w2q.shape[1]
    o = num_outputs

    b_pad = _round_up(b, 8)                    # sublane-align per-step slices
    tc = max(1, min(time_chunk, t_len))
    t_pad = _round_up(t_len, tc)
    n_chunks = t_pad // tc

    # time-major, batch-padded, flattened to (T*Bp, F); bf16 halves the only
    # streamed-input DMA (the MXU would cast to bf16 anyway).
    # TODO(synk): keep f32 here if bit-level agreement with the torch f32
    # linear1 matters more than bandwidth.
    xt = jnp.transpose(x, (1, 0, 2))
    xt = jnp.pad(xt, ((0, t_pad - t_len), (0, b_pad - b), (0, 0)))
    x_flat = xt.reshape(t_pad * b_pad, f).astype(jnp.bfloat16)

    # VMEM budget: 2x double-buffered x/out blocks + weights + scratch.
    f32b = 4
    need = (2 * tc * b_pad * f * 2                       # x blocks (bf16)
            + 2 * tc * b_pad * o * f32b                  # out blocks
            + 2 * 2 * (w1q.size + w2q.size + wcatq.size + wroq.size)  # weights
            + (tc * b_pad * h1 + b_pad * (h1 + 3 * h2 + o)) * f32b)   # scratch
    vmem_limit = int(min(64 * 1024 * 1024,
                         max(32 * 1024 * 1024, 2 * need + (1 << 20))))

    out = pl.pallas_call(
        _ahpc_chunk_kernel,
        out_shape=jax.ShapeDtypeStruct((t_pad, b_pad, o), jnp.float32),
        grid=(n_chunks,),
        in_specs=[
            pl.BlockSpec(memory_space=pltpu.MemorySpace.SMEM),      # scalars
            pl.BlockSpec((tc * b_pad, f), lambda i: (i, 0)),        # x chunk
            pl.BlockSpec(w1q.shape, lambda i: (0, 0)),              # w1
            pl.BlockSpec(w2q.shape, lambda i: (0, 0)),              # w2
            pl.BlockSpec(wcatq.shape, lambda i: (0, 0)),            # [wri|w3]
            pl.BlockSpec(wroq.shape, lambda i: (0, 0)),             # wro
        ],
        out_specs=pl.BlockSpec((tc, b_pad, o), lambda i: (i, 0, 0)),
        scratch_shapes=[
            pltpu.VMEM((tc * b_pad, h1), jnp.float32),   # chunk currents
            pltpu.VMEM((b_pad, h1), jnp.float32),        # leaky1 membrane
            pltpu.VMEM((b_pad, h2), jnp.float32),        # recurrent membrane
            pltpu.VMEM((b_pad, h2), jnp.float32),        # recurrent prev spike
            pltpu.VMEM((b_pad, o), jnp.float32),         # leaky2 membrane
            pltpu.VMEM((b_pad, h2), jnp.float32),        # pipelined feedback
        ],
        compiler_params=pltpu.CompilerParams(
            dimension_semantics=("arbitrary",),          # serial recurrence
            vmem_limit_bytes=vmem_limit,
        ),
    )(scalars, x_flat, w1q, w2q, wcatq, wroq)

    return out[:t_len, :b, :]


# ----------------------------------------------------------------------------
# Deterministic parameter construction + demo run.
# ----------------------------------------------------------------------------
def make_params(key, num_inputs, num_hidden_1, num_hidden_2, num_outputs,
                beta, threshold):
    k1, k2, k3, k4, k5 = jax.random.split(key, 5)
    # PyTorch Linear weight is [out, in]; we store the transposed (in, out)
    # layout used by the kernel's x @ W matmuls.
    w1 = jax.random.normal(k1, (num_inputs, num_hidden_1), jnp.float32) * 0.3
    w2 = jax.random.normal(k2, (num_hidden_1, num_hidden_2), jnp.float32) * 0.3
    wri = jax.random.normal(k3, (num_hidden_2, num_hidden_2), jnp.float32) * 0.2
    wro = jax.random.normal(k4, (num_hidden_2, num_hidden_2), jnp.float32) * 0.2
    w3 = jax.random.normal(k5, (num_hidden_2, num_outputs), jnp.float32) * 0.3
    # learn_beta / learn_threshold scalars init to (beta, threshold) everywhere.
    scalars = jnp.array(
        [beta, threshold, beta, threshold, beta, threshold], dtype=jnp.float32
    )
    return (w1, w2, wri, wro, w3), scalars


if __name__ == "__main__":
    # Small shapes consistent with the module's forward:
    # data: [batch, time, num_inputs] with time_dim=1.
    B, T = 4, 8
    NUM_INPUTS, H1, H2, NUM_OUTPUTS = 16, 32, 32, 8
    BETA, THRESHOLD = 0.9, 1.0

    key = jax.random.PRNGKey(0)
    kx, kp = jax.random.split(key)
    x = jax.random.normal(kx, (B, T, NUM_INPUTS), jnp.float32)

    weights, scalars = make_params(
        kp, NUM_INPUTS, H1, H2, NUM_OUTPUTS, BETA, THRESHOLD
    )

    prepared = prepare_weights(weights)      # fake-quantize once, not per call
    spk_rec = quant_ahpc_forward(
        x, *prepared, scalars, num_outputs=NUM_OUTPUTS, time_chunk=4
    )
    spk_rec = jax.block_until_ready(spk_rec)

    assert spk_rec.shape == (T, B, NUM_OUTPUTS)
    assert bool(jnp.all(jnp.isfinite(spk_rec)))
    assert bool(jnp.all((spk_rec == 0.0) | (spk_rec == 1.0)))  # binary spikes
    print("KERNEL_OK")
</pallas_src>

<mosaic_0001>
module attributes {stable_mosaic.version = 11 : i64} {
  func.func @_ahpc_chunk_kernel(%arg0: i32, %arg1: memref<6xf32, #tpu.memory_space<smem>>, %arg2: memref<32x16xbf16, #tpu.memory_space<vmem>>, %arg3: memref<16x32xbf16, #tpu.memory_space<vmem>>, %arg4: memref<32x32xbf16, #tpu.memory_space<vmem>>, %arg5: memref<32x256xbf16, #tpu.memory_space<vmem>>, %arg6: memref<32x32xbf16, #tpu.memory_space<vmem>>, %arg7: memref<4x8x8xf32, #tpu.memory_space<vmem>>, %arg8: memref<32x32xf32, #tpu.memory_space<vmem>>, %arg9: memref<8x32xf32, #tpu.memory_space<vmem>>, %arg10: memref<8x32xf32, #tpu.memory_space<vmem>>, %arg11: memref<8x32xf32, #tpu.memory_space<vmem>>, %arg12: memref<8x8xf32, #tpu.memory_space<vmem>>, %arg13: memref<8x32xf32, #tpu.memory_space<vmem>>) attributes {dimension_semantics = [#tpu.dimension_semantics<arbitrary>], iteration_bounds = array<i64: 2>, scalar_prefetch = 0 : i64, scratch_operands = 6 : i64, tpu.core_type = #tpu.core_type<tc>, window_params = [{transform_indices = @transform_0, window_bounds = array<i64: 6>}, {transform_indices = @transform_1, window_bounds = array<i64: 32, 16>}, {pipeline_mode = #tpu.pipeline_mode<synchronous>, transform_indices = @transform_2, window_bounds = array<i64: 16, 32>}, {pipeline_mode = #tpu.pipeline_mode<synchronous>, transform_indices = @transform_3, window_bounds = array<i64: 32, 32>}, {pipeline_mode = #tpu.pipeline_mode<synchronous>, transform_indices = @transform_4, window_bounds = array<i64: 32, 256>}, {pipeline_mode = #tpu.pipeline_mode<synchronous>, transform_indices = @transform_5, window_bounds = array<i64: 32, 32>}, {transform_indices = @transform_6, window_bounds = array<i64: 4, 8, 8>}]} {
    %c0 = arith.constant 0 : index
    %0 = memref.load %arg1[%c0] : memref<6xf32, #tpu.memory_space<smem>>
    %c1 = arith.constant 1 : index
    %1 = memref.load %arg1[%c1] : memref<6xf32, #tpu.memory_space<smem>>
    %c2 = arith.constant 2 : index
    %2 = memref.load %arg1[%c2] : memref<6xf32, #tpu.memory_space<smem>>
    %c3 = arith.constant 3 : index
    %3 = memref.load %arg1[%c3] : memref<6xf32, #tpu.memory_space<smem>>
    %c4 = arith.constant 4 : index
    %4 = memref.load %arg1[%c4] : memref<6xf32, #tpu.memory_space<smem>>
    %c5 = arith.constant 5 : index
    %5 = memref.load %arg1[%c5] : memref<6xf32, #tpu.memory_space<smem>>
    %c0_i32 = arith.constant 0 : i32
    %6 = arith.cmpi eq, %arg0, %c0_i32 : i32
    %7 = arith.extui %6 : i1 to i32
    %c0_i32_0 = arith.constant 0 : i32
    %8 = arith.cmpi ne, %7, %c0_i32_0 : i32
    scf.if %8 {
      %cst_95 = arith.constant 0.000000e+00 : f32
      %231 = vector.broadcast %cst_95 : f32 to vector<8x32xf32>
      %c0_96 = arith.constant 0 : index
      %c0_97 = arith.constant 0 : index
      %232 = vector.load %arg9[%c0_96, %c0_97] : memref<8x32xf32, #tpu.memory_space<vmem>>, vector<8x32xf32>
      tpu.vector_store %arg9[%c0_96, %c0_97], %231 {strides = array<i32>} : memref<8x32xf32, #tpu.memory_space<vmem>>, vector<8x32xf32>,
      %cst_98 = arith.constant 0.000000e+00 : f32
      %233 = vector.broadcast %cst_98 : f32 to vector<8x32xf32>
      %c0_99 = arith.constant 0 : index
      %c0_100 = arith.constant 0 : index
      %234 = vector.load %arg10[%c0_99, %c0_100] : memref<8x32xf32, #tpu.memory_space<vmem>>, vector<8x32xf32>
      tpu.vector_store %arg10[%c0_99, %c0_100], %233 {strides = array<i32>} : memref<8x32xf32, #tpu.memory_space<vmem>>, vector<8x32xf32>,
      %cst_101 = arith.constant 0.000000e+00 : f32
      %235 = vector.broadcast %cst_101 : f32 to vector<8x32xf32>
      %c0_102 = arith.constant 0 : index
      %c0_103 = arith.constant 0 : index
      %236 = vector.load %arg11[%c0_102, %c0_103] : memref<8x32xf32, #tpu.memory_space<vmem>>, vector<8x32xf32>
      tpu.vector_store %arg11[%c0_102, %c0_103], %235 {strides = array<i32>} : memref<8x32xf32, #tpu.memory_space<vmem>>, vector<8x32xf32>,
      %cst_104 = arith.constant 0.000000e+00 : f32
      %237 = vector.broadcast %cst_104 : f32 to vector<8x8xf32>
      %c0_105 = arith.constant 0 : index
      %c0_106 = arith.constant 0 : index
      %238 = vector.load %arg12[%c0_105, %c0_106] : memref<8x8xf32, #tpu.memory_space<vmem>>, vector<8x8xf32>
      tpu.vector_store %arg12[%c0_105, %c0_106], %237 {strides = array<i32>} : memref<8x8xf32, #tpu.memory_space<vmem>>, vector<8x8xf32>,
      %cst_107 = arith.constant 0.000000e+00 : f32
      %239 = vector.broadcast %cst_107 : f32 to vector<8x32xf32>
      %c0_108 = arith.constant 0 : index
      %c0_109 = arith.constant 0 : index
      %240 = vector.load %arg13[%c0_108, %c0_109] : memref<8x32xf32, #tpu.memory_space<vmem>>, vector<8x32xf32>
      tpu.vector_store %arg13[%c0_108, %c0_109], %239 {strides = array<i32>} : memref<8x32xf32, #tpu.memory_space<vmem>>, vector<8x32xf32>,
    } else {
    }
    %c0_1 = arith.constant 0 : index
    %c0_2 = arith.constant 0 : index
    %9 = vector.load %arg2[%c0_1, %c0_2] : memref<32x16xbf16, #tpu.memory_space<vmem>>, vector<32x16xbf16>
    %c0_3 = arith.constant 0 : index
    %c0_4 = arith.constant 0 : index
    %10 = vector.load %arg3[%c0_3, %c0_4] : memref<16x32xbf16, #tpu.memory_space<vmem>>, vector<16x32xbf16>
    %cst = arith.constant dense<0.000000e+00> : vector<32x32xf32>
    %11 = tpu.matmul %9, %10, %cst {dimension_numbers = #tpu.dot_dimension_numbers<[1], [0], [0], [1], [0, 0, 1, 1], [], []>} : vector<32x16xbf16>, vector<16x32xbf16>, vector<32x32xf32> -> vector<32x32xf32>
    %c0_5 = arith.constant 0 : index
    %c0_6 = arith.constant 0 : index
    %12 = vector.load %arg8[%c0_5, %c0_6] : memref<32x32xf32, #tpu.memory_space<vmem>>, vector<32x32xf32>
    tpu.vector_store %arg8[%c0_5, %c0_6], %11 {strides = array<i32>} : memref<32x32xf32, #tpu.memory_space<vmem>>, vector<32x32xf32>,
    %c0_7 = arith.constant 0 : index
    %c0_8 = arith.constant 0 : index
    %13 = vector.load %arg9[%c0_7, %c0_8] : memref<8x32xf32, #tpu.memory_space<vmem>>, vector<8x32xf32>
    %c0_9 = arith.constant 0 : index
    %c0_10 = arith.constant 0 : index
    %14 = vector.load %arg10[%c0_9, %c0_10] : memref<8x32xf32, #tpu.memory_space<vmem>>, vector<8x32xf32>
    %c0_11 = arith.constant 0 : index
    %c0_12 = arith.constant 0 : index
    %15 = vector.load %arg11[%c0_11, %c0_12] : memref<8x32xf32, #tpu.memory_space<vmem>>, vector<8x32xf32>
    %c0_13 = arith.constant 0 : index
    %c0_14 = arith.constant 0 : index
    %16 = vector.load %arg12[%c0_13, %c0_14] : memref<8x8xf32, #tpu.memory_space<vmem>>, vector<8x8xf32>
    %c0_15 = arith.constant 0 : index
    %c0_16 = arith.constant 0 : index
    %17 = vector.load %arg13[%c0_15, %c0_16] : memref<8x32xf32, #tpu.memory_space<vmem>>, vector<8x32xf32>
    %c0_i32_17 = arith.constant 0 : i32
    %c8_i32 = arith.constant 8 : i32
    %18 = arith.muli %c0_i32_17, %c8_i32 : i32
    %19 = tpu.assume_multiple %18, 8 : i32
    %20 = arith.index_cast %19 : i32 to index
    %c0_18 = arith.constant 0 : index
    %21 = vector.load %arg8[%20, %c0_18] : memref<32x32xf32, #tpu.memory_space<vmem>>, vector<8x32xf32>
    %22 = vector.broadcast %0 : f32 to vector<8x32xf32>
    %23 = arith.mulf %22, %13 : vector<8x32xf32>
    %24 = arith.addf %23, %21 : vector<8x32xf32>
    %25 = vector.broadcast %1 : f32 to vector<8x32xf32>
    %26 = arith.cmpf ogt, %24, %25 : vector<8x32xf32>
    %cst_19 = arith.constant 0.000000e+00 : f32
    %27 = vector.broadcast %cst_19 : f32 to vector<8x32xf32>
    %28 = arith.select %26, %27, %24 : vector<8x32xi1>, vector<8x32xf32>
    %29 = arith.extui %26 : vector<8x32xi1> to vector<8x32xi32>
    %30 = arith.sitofp %29 : vector<8x32xi32> to vector<8x32xf32>
    %31 = arith.truncf %30 : vector<8x32xf32> to vector<8x32xbf16>
    %c0_20 = arith.constant 0 : index
    %c0_21 = arith.constant 0 : index
    %32 = vector.load %arg4[%c0_20, %c0_21] : memref<32x32xbf16, #tpu.memory_space<vmem>>, vector<32x32xbf16>
    %cst_22 = arith.constant dense<0.000000e+00> : vector<8x32xf32>
    %33 = tpu.matmul %31, %32, %cst_22 {dimension_numbers = #tpu.dot_dimension_numbers<[1], [0], [0], [1], [0, 0, 1, 1], [], []>} : vector<8x32xbf16>, vector<32x32xbf16>, vector<8x32xf32> -> vector<8x32xf32>
    %34 = vector.broadcast %2 : f32 to vector<8x32xf32>
    %35 = arith.mulf %34, %14 : vector<8x32xf32>
    %36 = arith.addf %35, %33 : vector<8x32xf32>
    %37 = arith.addf %36, %17 : vector<8x32xf32>
    %cst_23 = arith.constant 1.000000e+00 : f32
    %38 = vector.broadcast %cst_23 : f32 to vector<8x32xf32>
    %39 = arith.subf %38, %15 : vector<8x32xf32>
    %40 = arith.mulf %37, %39 : vector<8x32xf32>
    %41 = vector.broadcast %3 : f32 to vector<8x32xf32>
    %42 = arith.cmpf ogt, %40, %41 : vector<8x32xf32>
    %43 = arith.extui %42 : vector<8x32xi1> to vector<8x32xi32>
    %44 = arith.sitofp %43 : vector<8x32xi32> to vector<8x32xf32>
    %45 = arith.truncf %44 : vector<8x32xf32> to vector<8x32xbf16>
    %c0_24 = arith.constant 0 : index
    %c0_25 = arith.constant 0 : index
    %46 = vector.load %arg5[%c0_24, %c0_25] : memref<32x256xbf16, #tpu.memory_space<vmem>>, vector<32x256xbf16>
    %cst_26 = arith.constant dense<0.000000e+00> : vector<8x256xf32>
    %47 = tpu.matmul %45, %46, %cst_26 {dimension_numbers = #tpu.dot_dimension_numbers<[1], [0], [0], [1], [0, 0, 1, 1], [], []>} : vector<8x32xbf16>, vector<32x256xbf16>, vector<8x256xf32> -> vector<8x256xf32>
    %48 = vector.extract_strided_slice %47 {offsets = [0, 0], sizes = [8, 32], strides = [1, 1]} : vector<8x256xf32> to vector<8x32xf32>
    %49 = vector.extract_strided_slice %47 {offsets = [0, 128], sizes = [8, 8], strides = [1, 1]} : vector<8x256xf32> to vector<8x8xf32>
    %50 = vector.broadcast %4 : f32 to vector<8x8xf32>
    %51 = arith.mulf %50, %16 : vector<8x8xf32>
    %52 = arith.addf %51, %49 : vector<8x8xf32>
    %53 = vector.broadcast %5 : f32 to vector<8x8xf32>
    %54 = arith.cmpf ogt, %52, %53 : vector<8x8xf32>
    %cst_27 = arith.constant 0.000000e+00 : f32
    %55 = vector.broadcast %cst_27 : f32 to vector<8x8xf32>
    %56 = arith.select %54, %55, %52 : vector<8x8xi1>, vector<8x8xf32>
    %57 = arith.extui %54 : vector<8x8xi1> to vector<8x8xi32>
    %58 = arith.sitofp %57 : vector<8x8xi32> to vector<8x8xf32>
    %59 = arith.index_cast %c0_i32_17 : i32 to index
    %c0_28 = arith.constant 0 : index
    %c0_29 = arith.constant 0 : index
    %60 = vector.load %arg7[%59, %c0_28, %c0_29] : memref<4x8x8xf32, #tpu.memory_space<vmem>>, vector<1x8x8xf32>
    %61 = vector.shape_cast %60 : vector<1x8x8xf32> to vector<8x8xf32>
    %62 = vector.shape_cast %58 : vector<8x8xf32> to vector<1x8x8xf32>
    tpu.vector_store %arg7[%59, %c0_28, %c0_29], %62 {strides = array<i32>} : memref<4x8x8xf32, #tpu.memory_space<vmem>>, vector<1x8x8xf32>,
    %cst_30 = arith.constant 0.000000e+00 : f32
    %63 = vector.broadcast %cst_30 : f32 to vector<8x32xf32>
    %64 = arith.maximumf %48, %63 : vector<8x32xf32>
    %65 = arith.truncf %64 : vector<8x32xf32> to vector<8x32xbf16>
    %c0_31 = arith.constant 0 : index
    %c0_32 = arith.constant 0 : index
    %66 = vector.load %arg6[%c0_31, %c0_32] : memref<32x32xbf16, #tpu.memory_space<vmem>>, vector<32x32xbf16>
    %cst_33 = arith.constant dense<0.000000e+00> : vector<8x32xf32>
    %67 = tpu.matmul %65, %66, %cst_33 {dimension_numbers = #tpu.dot_dimension_numbers<[1], [0], [0], [1], [0, 0, 1, 1], [], []>} : vector<8x32xbf16>, vector<32x32xbf16>, vector<8x32xf32> -> vector<8x32xf32>
    %68 = arith.extui %42 : vector<8x32xi1> to vector<8x32xi32>
    %69 = arith.sitofp %68 : vector<8x32xi32> to vector<8x32xf32>
    %c1_i32 = arith.constant 1 : i32
    %c8_i32_34 = arith.constant 8 : i32
    %70 = arith.muli %c1_i32, %c8_i32_34 : i32
    %71 = tpu.assume_multiple %70, 8 : i32
    %72 = arith.index_cast %71 : i32 to index
    %c0_35 = arith.constant 0 : index
    %73 = vector.load %arg8[%72, %c0_35] : memref<32x32xf32, #tpu.memory_space<vmem>>, vector<8x32xf32>
    %74 = vector.broadcast %0 : f32 to vector<8x32xf32>
    %75 = arith.mulf %74, %28 : vector<8x32xf32>
    %76 = arith.addf %75, %73 : vector<8x32xf32>
    %77 = vector.broadcast %1 : f32 to vector<8x32xf32>
    %78 = arith.cmpf ogt, %76, %77 : vector<8x32xf32>
    %cst_36 = arith.constant 0.000000e+00 : f32
    %79 = vector.broadcast %cst_36 : f32 to vector<8x32xf32>
    %80 = arith.select %78, %79, %76 : vector<8x32xi1>, vector<8x32xf32>
    %81 = arith.extui %78 : vector<8x32xi1> to vector<8x32xi32>
    %82 = arith.sitofp %81 : vector<8x32xi32> to vector<8x32xf32>
    %83 = arith.truncf %82 : vector<8x32xf32> to vector<8x32xbf16>
    %c0_37 = arith.constant 0 : index
    %c0_38 = arith.constant 0 : index
    %84 = vector.load %arg4[%c0_37, %c0_38] : memref<32x32xbf16, #tpu.memory_space<vmem>>, vector<32x32xbf16>
    %cst_39 = arith.constant dense<0.000000e+00> : vector<8x32xf32>
    %85 = tpu.matmul %83, %84, %cst_39 {dimension_numbers = #tpu.dot_dimension_numbers<[1], [0], [0], [1], [0, 0, 1, 1], [], []>} : vector<8x32xbf16>, vector<32x32xbf16>, vector<8x32xf32> -> vector<8x32xf32>
    %86 = vector.broadcast %2 : f32 to vector<8x32xf32>
    %87 = arith.mulf %86, %40 : vector<8x32xf32>
    %88 = arith.addf %87, %85 : vector<8x32xf32>
    %89 = arith.addf %88, %67 : vector<8x32xf32>
    %cst_40 = arith.constant 1.000000e+00 : f32
    %90 = vector.broadcast %cst_40 : f32 to vector<8x32xf32>
    %91 = arith.subf %90, %69 : vector<8x32xf32>
    %92 = arith.mulf %89, %91 : vector<8x32xf32>
    %93 = vector.broadcast %3 : f32 to vector<8x32xf32>
    %94 = arith.cmpf ogt, %92, %93 : vector<8x32xf32>
    %95 = arith.extui %94 : vector<8x32xi1> to vector<8x32xi32>
    %96 = arith.sitofp %95 : vector<8x32xi32> to vector<8x32xf32>
    %97 = arith.truncf %96 : vector<8x32xf32> to vector<8x32xbf16>
    %c0_41 = arith.constant 0 : index
    %c0_42 = arith.constant 0 : index
    %98 = vector.load %arg5[%c0_41, %c0_42] : memref<32x256xbf16, #tpu.memory_space<vmem>>, vector<32x256xbf16>
    %cst_43 = arith.constant dense<0.000000e+00> : vector<8x256xf32>
    %99 = tpu.matmul %97, %98, %cst_43 {dimension_numbers = #tpu.dot_dimension_numbers<[1], [0], [0], [1], [0, 0, 1, 1], [], []>} : vector<8x32xbf16>, vector<32x256xbf16>, vector<8x256xf32> -> vector<8x256xf32>
    %100 = vector.extract_strided_slice %99 {offsets = [0, 0], sizes = [8, 32], strides = [1, 1]} : vector<8x256xf32> to vector<8x32xf32>
    %101 = vector.extract_strided_slice %99 {offsets = [0, 128], sizes = [8, 8], strides = [1, 1]} : vector<8x256xf32> to vector<8x8xf32>
    %102 = vector.broadcast %4 : f32 to vector<8x8xf32>
    %103 = arith.mulf %102, %56 : vector<8x8xf32>
    %104 = arith.addf %103, %101 : vector<8x8xf32>
    %105 = vector.broadcast %5 : f32 to vector<8x8xf32>
    %106 = arith.cmpf ogt, %104, %105 : vector<8x8xf32>
    %cst_44 = arith.constant 0.000000e+00 : f32
    %107 = vector.broadcast %cst_44 : f32 to vector<8x8xf32>
    %108 = arith.select %106, %107, %104 : vector<8x8xi1>, vector<8x8xf32>
    %109 = arith.extui %106 : vector<8x8xi1> to vector<8x8xi32>
    %110 = arith.sitofp %109 : vector<8x8xi32> to vector<8x8xf32>
    %111 = arith.index_cast %c1_i32 : i32 to index
    %c0_45 = arith.constant 0 : index
    %c0_46 = arith.constant 0 : index
    %112 = vector.load %arg7[%111, %c0_45, %c0_46] : memref<4x8x8xf32, #tpu.memory_space<vmem>>, vector<1x8x8xf32>
    %113 = vector.shape_cast %112 : vector<1x8x8xf32> to vector<8x8xf32>
    %114 = vector.shape_cast %110 : vector<8x8xf32> to vector<1x8x8xf32>
    tpu.vector_store %arg7[%111, %c0_45, %c0_46], %114 {strides = array<i32>} : memref<4x8x8xf32, #tpu.memory_space<vmem>>, vector<1x8x8xf32>,
    %cst_47 = arith.constant 0.000000e+00 : f32
    %115 = vector.broadcast %cst_47 : f32 to vector<8x32xf32>
    %116 = arith.maximumf %100, %115 : vector<8x32xf32>
    %117 = arith.truncf %116 : vector<8x32xf32> to vector<8x32xbf16>
    %c0_48 = arith.constant 0 : index
    %c0_49 = arith.constant 0 : index
    %118 = vector.load %arg6[%c0_48, %c0_49] : memref<32x32xbf16, #tpu.memory_space<vmem>>, vector<32x32xbf16>
    %cst_50 = arith.constant dense<0.000000e+00> : vector<8x32xf32>
    %119 = tpu.matmul %117, %118, %cst_50 {dimension_numbers = #tpu.dot_dimension_numbers<[1], [0], [0], [1], [0, 0, 1, 1], [], []>} : vector<8x32xbf16>, vector<32x32xbf16>, vector<8x32xf32> -> vector<8x32xf32>
    %120 = arith.extui %94 : vector<8x32xi1> to vector<8x32xi32>
    %121 = arith.sitofp %120 : vector<8x32xi32> to vector<8x32xf32>
    %c2_i32 = arith.constant 2 : i32
    %c8_i32_51 = arith.constant 8 : i32
    %122 = arith.muli %c2_i32, %c8_i32_51 : i32
    %123 = tpu.assume_multiple %122, 8 : i32
    %124 = arith.index_cast %123 : i32 to index
    %c0_52 = arith.constant 0 : index
    %125 = vector.load %arg8[%124, %c0_52] : memref<32x32xf32, #tpu.memory_space<vmem>>, vector<8x32xf32>
    %126 = vector.broadcast %0 : f32 to vector<8x32xf32>
    %127 = arith.mulf %126, %80 : vector<8x32xf32>
    %128 = arith.addf %127, %125 : vector<8x32xf32>
    %129 = vector.broadcast %1 : f32 to vector<8x32xf32>
    %130 = arith.cmpf ogt, %128, %129 : vector<8x32xf32>
    %cst_53 = arith.constant 0.000000e+00 : f32
    %131 = vector.broadcast %cst_53 : f32 to vector<8x32xf32>
    %132 = arith.select %130, %131, %128 : vector<8x32xi1>, vector<8x32xf32>
    %133 = arith.extui %130 : vector<8x32xi1> to vector<8x32xi32>
    %134 = arith.sitofp %133 : vector<8x32xi32> to vector<8x32xf32>
    %135 = arith.truncf %134 : vector<8x32xf32> to vector<8x32xbf16>
    %c0_54 = arith.constant 0 : index
    %c0_55 = arith.constant 0 : index
    %136 = vector.load %arg4[%c0_54, %c0_55] : memref<32x32xbf16, #tpu.memory_space<vmem>>, vector<32x32xbf16>
    %cst_56 = arith.constant dense<0.000000e+00> : vector<8x32xf32>
    %137 = tpu.matmul %135, %136, %cst_56 {dimension_numbers = #tpu.dot_dimension_numbers<[1], [0], [0], [1], [0, 0, 1, 1], [], []>} : vector<8x32xbf16>, vector<32x32xbf16>, vector<8x32xf32> -> vector<8x32xf32>
    %138 = vector.broadcast %2 : f32 to vector<8x32xf32>
    %139 = arith.mulf %138, %92 : vector<8x32xf32>
    %140 = arith.addf %139, %137 : vector<8x32xf32>
    %141 = arith.addf %140, %119 : vector<8x32xf32>
    %cst_57 = arith.constant 1.000000e+00 : f32
    %142 = vector.broadcast %cst_57 : f32 to vector<8x32xf32>
    %143 = arith.subf %142, %121 : vector<8x32xf32>
    %144 = arith.mulf %141, %143 : vector<8x32xf32>
    %145 = vector.broadcast %3 : f32 to vector<8x32xf32>
    %146 = arith.cmpf ogt, %144, %145 : vector<8x32xf32>
    %147 = arith.extui %146 : vector<8x32xi1> to vector<8x32xi32>
    %148 = arith.sitofp %147 : vector<8x32xi32> to vector<8x32xf32>
    %149 = arith.truncf %148 : vector<8x32xf32> to vector<8x32xbf16>
    %c0_58 = arith.constant 0 : index
    %c0_59 = arith.constant 0 : index
    %150 = vector.load %arg5[%c0_58, %c0_59] : memref<32x256xbf16, #tpu.memory_space<vmem>>, vector<32x256xbf16>
    %cst_60 = arith.constant dense<0.000000e+00> : vector<8x256xf32>
    %151 = tpu.matmul %149, %150, %cst_60 {dimension_numbers = #tpu.dot_dimension_numbers<[1], [0], [0], [1], [0, 0, 1, 1], [], []>} : vector<8x32xbf16>, vector<32x256xbf16>, vector<8x256xf32> -> vector<8x256xf32>
    %152 = vector.extract_strided_slice %151 {offsets = [0, 0], sizes = [8, 32], strides = [1, 1]} : vector<8x256xf32> to vector<8x32xf32>
    %153 = vector.extract_strided_slice %151 {offsets = [0, 128], sizes = [8, 8], strides = [1, 1]} : vector<8x256xf32> to vector<8x8xf32>
    %154 = vector.broadcast %4 : f32 to vector<8x8xf32>
    %155 = arith.mulf %154, %108 : vector<8x8xf32>
    %156 = arith.addf %155, %153 : vector<8x8xf32>
    %157 = vector.broadcast %5 : f32 to vector<8x8xf32>
    %158 = arith.cmpf ogt, %156, %157 : vector<8x8xf32>
    %cst_61 = arith.constant 0.000000e+00 : f32
    %159 = vector.broadcast %cst_61 : f32 to vector<8x8xf32>
    %160 = arith.select %158, %159, %156 : vector<8x8xi1>, vector<8x8xf32>
    %161 = arith.extui %158 : vector<8x8xi1> to vector<8x8xi32>
    %162 = arith.sitofp %161 : vector<8x8xi32> to vector<8x8xf32>
    %163 = arith.index_cast %c2_i32 : i32 to index
    %c0_62 = arith.constant 0 : index
    %c0_63 = arith.constant 0 : index
    %164 = vector.load %arg7[%163, %c0_62, %c0_63] : memref<4x8x8xf32, #tpu.memory_space<vmem>>, vector<1x8x8xf32>
    %165 = vector.shape_cast %164 : vector<1x8x8xf32> to vector<8x8xf32>
    %166 = vector.shape_cast %162 : vector<8x8xf32> to vector<1x8x8xf32>
    tpu.vector_store %arg7[%163, %c0_62, %c0_63], %166 {strides = array<i32>} : memref<4x8x8xf32, #tpu.memory_space<vmem>>, vector<1x8x8xf32>,
    %cst_64 = arith.constant 0.000000e+00 : f32
    %167 = vector.broadcast %cst_64 : f32 to vector<8x32xf32>
    %168 = arith.maximumf %152, %167 : vector<8x32xf32>
    %169 = arith.truncf %168 : vector<8x32xf32> to vector<8x32xbf16>
    %c0_65 = arith.constant 0 : index
    %c0_66 = arith.constant 0 : index
    %170 = vector.load %arg6[%c0_65, %c0_66] : memref<32x32xbf16, #tpu.memory_space<vmem>>, vector<32x32xbf16>
    %cst_67 = arith.constant dense<0.000000e+00> : vector<8x32xf32>
    %171 = tpu.matmul %169, %170, %cst_67 {dimension_numbers = #tpu.dot_dimension_numbers<[1], [0], [0], [1], [0, 0, 1, 1], [], []>} : vector<8x32xbf16>, vector<32x32xbf16>, vector<8x32xf32> -> vector<8x32xf32>
    %172 = arith.extui %146 : vector<8x32xi1> to vector<8x32xi32>
    %173 = arith.sitofp %172 : vector<8x32xi32> to vector<8x32xf32>
    %c3_i32 = arith.constant 3 : i32
    %c8_i32_68 = arith.constant 8 : i32
    %174 = arith.muli %c3_i32, %c8_i32_68 : i32
    %175 = tpu.assume_multiple %174, 8 : i32
    %176 = arith.index_cast %175 : i32 to index
    %c0_69 = arith.constant 0 : index
    %177 = vector.load %arg8[%176, %c0_69] : memref<32x32xf32, #tpu.memory_space<vmem>>, vector<8x32xf32>
    %178 = vector.broadcast %0 : f32 to vector<8x32xf32>
    %179 = arith.mulf %178, %132 : vector<8x32xf32>
    %180 = arith.addf %179, %177 : vector<8x32xf32>
    %181 = vector.broadcast %1 : f32 to vector<8x32xf32>
    %182 = arith.cmpf ogt, %180, %181 : vector<8x32xf32>
    %cst_70 = arith.constant 0.000000e+00 : f32
    %183 = vector.broadcast %cst_70 : f32 to vector<8x32xf32>
    %184 = arith.select %182, %183, %180 : vector<8x32xi1>, vector<8x32xf32>
    %185 = arith.extui %182 : vector<8x32xi1> to vector<8x32xi32>
    %186 = arith.sitofp %185 : vector<8x32xi32> to vector<8x32xf32>
    %187 = arith.truncf %186 : vector<8x32xf32> to vector<8x32xbf16>
    %c0_71 = arith.constant 0 : index
    %c0_72 = arith.constant 0 : index
    %188 = vector.load %arg4[%c0_71, %c0_72] : memref<32x32xbf16, #tpu.memory_space<vmem>>, vector<32x32xbf16>
    %cst_73 = arith.constant dense<0.000000e+00> : vector<8x32xf32>
    %189 = tpu.matmul %187, %188, %cst_73 {dimension_numbers = #tpu.dot_dimension_numbers<[1], [0], [0], [1], [0, 0, 1, 1], [], []>} : vector<8x32xbf16>, vector<32x32xbf16>, vector<8x32xf32> -> vector<8x32xf32>
    %190 = vector.broadcast %2 : f32 to vector<8x32xf32>
    %191 = arith.mulf %190, %144 : vector<8x32xf32>
    %192 = arith.addf %191, %189 : vector<8x32xf32>
    %193 = arith.addf %192, %171 : vector<8x32xf32>
    %cst_74 = arith.constant 1.000000e+00 : f32
    %194 = vector.broadcast %cst_74 : f32 to vector<8x32xf32>
    %195 = arith.subf %194, %173 : vector<8x32xf32>
    %196 = arith.mulf %193, %195 : vector<8x32xf32>
    %197 = vector.broadcast %3 : f32 to vector<8x32xf32>
    %198 = arith.cmpf ogt, %196, %197 : vector<8x32xf32>
    %199 = arith.extui %198 : vector<8x32xi1> to vector<8x32xi32>
    %200 = arith.sitofp %199 : vector<8x32xi32> to vector<8x32xf32>
    %201 = arith.truncf %200 : vector<8x32xf32> to vector<8x32xbf16>
    %c0_75 = arith.constant 0 : index
    %c0_76 = arith.constant 0 : index
    %202 = vector.load %arg5[%c0_75, %c0_76] : memref<32x256xbf16, #tpu.memory_space<vmem>>, vector<32x256xbf16>
    %cst_77 = arith.constant dense<0.000000e+00> : vector<8x256xf32>
    %203 = tpu.matmul %201, %202, %cst_77 {dimension_numbers = #tpu.dot_dimension_numbers<[1], [0], [0], [1], [0, 0, 1, 1], [], []>} : vector<8x32xbf16>, vector<32x256xbf16>, vector<8x256xf32> -> vector<8x256xf32>
    %204 = vector.extract_strided_slice %203 {offsets = [0, 0], sizes = [8, 32], strides = [1, 1]} : vector<8x256xf32> to vector<8x32xf32>
    %205 = vector.extract_strided_slice %203 {offsets = [0, 128], sizes = [8, 8], strides = [1, 1]} : vector<8x256xf32> to vector<8x8xf32>
    %206 = vector.broadcast %4 : f32 to vector<8x8xf32>
    %207 = arith.mulf %206, %160 : vector<8x8xf32>
    %208 = arith.addf %207, %205 : vector<8x8xf32>
    %209 = vector.broadcast %5 : f32 to vector<8x8xf32>
    %210 = arith.cmpf ogt, %208, %209 : vector<8x8xf32>
    %cst_78 = arith.constant 0.000000e+00 : f32
    %211 = vector.broadcast %cst_78 : f32 to vector<8x8xf32>
    %212 = arith.select %210, %211, %208 : vector<8x8xi1>, vector<8x8xf32>
    %213 = arith.extui %210 : vector<8x8xi1> to vector<8x8xi32>
    %214 = arith.sitofp %213 : vector<8x8xi32> to vector<8x8xf32>
    %215 = arith.index_cast %c3_i32 : i32 to index
    %c0_79 = arith.constant 0 : index
    %c0_80 = arith.constant 0 : index
    %216 = vector.load %arg7[%215, %c0_79, %c0_80] : memref<4x8x8xf32, #tpu.memory_space<vmem>>, vector<1x8x8xf32>
    %217 = vector.shape_cast %216 : vector<1x8x8xf32> to vector<8x8xf32>
    %218 = vector.shape_cast %214 : vector<8x8xf32> to vector<1x8x8xf32>
    tpu.vector_store %arg7[%215, %c0_79, %c0_80], %218 {strides = array<i32>} : memref<4x8x8xf32, #tpu.memory_space<vmem>>, vector<1x8x8xf32>,
    %cst_81 = arith.constant 0.000000e+00 : f32
    %219 = vector.broadcast %cst_81 : f32 to vector<8x32xf32>
    %220 = arith.maximumf %204, %219 : vector<8x32xf32>
    %221 = arith.truncf %220 : vector<8x32xf32> to vector<8x32xbf16>
    %c0_82 = arith.constant 0 : index
    %c0_83 = arith.constant 0 : index
    %222 = vector.load %arg6[%c0_82, %c0_83] : memref<32x32xbf16, #tpu.memory_space<vmem>>, vector<32x32xbf16>
    %cst_84 = arith.constant dense<0.000000e+00> : vector<8x32xf32>
    %223 = tpu.matmul %221, %222, %cst_84 {dimension_numbers = #tpu.dot_dimension_numbers<[1], [0], [0], [1], [0, 0, 1, 1], [], []>} : vector<8x32xbf16>, vector<32x32xbf16>, vector<8x32xf32> -> vector<8x32xf32>
    %224 = arith.extui %198 : vector<8x32xi1> to vector<8x32xi32>
    %225 = arith.sitofp %224 : vector<8x32xi32> to vector<8x32xf32>
    %c4_i32 = arith.constant 4 : i32
    %c0_85 = arith.constant 0 : index
    %c0_86 = arith.constant 0 : index
    %226 = vector.load %arg9[%c0_85, %c0_86] : memref<8x32xf32, #tpu.memory_space<vmem>>, vector<8x32xf32>
    tpu.vector_store %arg9[%c0_85, %c0_86], %184 {strides = array<i32>} : memref<8x32xf32, #tpu.memory_space<vmem>>, vector<8x32xf32>,
    %c0_87 = arith.constant 0 : index
    %c0_88 = arith.constant 0 : index
    %227 = vector.load %arg10[%c0_87, %c0_88] : memref<8x32xf32, #tpu.memory_space<vmem>>, vector<8x32xf32>
    tpu.vector_store %arg10[%c0_87, %c0_88], %196 {strides = array<i32>} : memref<8x32xf32, #tpu.memory_space<vmem>>, vector<8x32xf32>,
    %c0_89 = arith.constant 0 : index
    %c0_90 = arith.constant 0 : index
    %228 = vector.load %arg11[%c0_89, %c0_90] : memref<8x32xf32, #tpu.memory_space<vmem>>, vector<8x32xf32>
    tpu.vector_store %arg11[%c0_89, %c0_90], %225 {strides = array<i32>} : memref<8x32xf32, #tpu.memory_space<vmem>>, vector<8x32xf32>,
    %c0_91 = arith.constant 0 : index
    %c0_92 = arith.constant 0 : index
    %229 = vector.load %arg12[%c0_91, %c0_92] : memref<8x8xf32, #tpu.memory_space<vmem>>, vector<8x8xf32>
    tpu.vector_store %arg12[%c0_91, %c0_92], %212 {strides = array<i32>} : memref<8x8xf32, #tpu.memory_space<vmem>>, vector<8x8xf32>,
    %c0_93 = arith.constant 0 : index
    %c0_94 = arith.constant 0 : index
    %230 = vector.load %arg13[%c0_93, %c0_94] : memref<8x32xf32, #tpu.memory_space<vmem>>, vector<8x32xf32>
    tpu.vector_store %arg13[%c0_93, %c0_94], %223 {strides = array<i32>} : memref<8x32xf32, #tpu.memory_space<vmem>>, vector<8x32xf32>,
    return
  }
  func.func @transform_0(%arg0: i32) -> i32 {
    %c0_i32 = arith.constant 0 : i32
    %c0_i32_0 = arith.constant 0 : i32
    return %c0_i32 : i32
  }
  func.func @transform_1(%arg0: i32) -> (i32, i32) {
    %c0_i32 = arith.constant 0 : i32
    %c0_i32_0 = arith.constant 0 : i32
    return %arg0, %c0_i32 : i32, i32
  }
  func.func @transform_2(%arg0: i32) -> (i32, i32) {
    %c0_i32 = arith.constant 0 : i32
    %c0_i32_0 = arith.constant 0 : i32
    %c0_i32_1 = arith.constant 0 : i32
    return %c0_i32, %c0_i32_0 : i32, i32
  }
  func.func @transform_3(%arg0: i32) -> (i32, i32) {
    %c0_i32 = arith.constant 0 : i32
    %c0_i32_0 = arith.constant 0 : i32
    %c0_i32_1 = arith.constant 0 : i32
    return %c0_i32, %c0_i32_0 : i32, i32
  }
  func.func @transform_4(%arg0: i32) -> (i32, i32) {
    %c0_i32 = arith.constant 0 : i32
    %c0_i32_0 = arith.constant 0 : i32
    %c0_i32_1 = arith.constant 0 : i32
    return %c0_i32, %c0_i32_0 : i32, i32
  }
  func.func @transform_5(%arg0: i32) -> (i32, i32) {
    %c0_i32 = arith.constant 0 : i32
    %c0_i32_0 = arith.constant 0 : i32
    %c0_i32_1 = arith.constant 0 : i32
    return %c0_i32, %c0_i32_0 : i32, i32
  }
  func.func @transform_6(%arg0: i32) -> (i32, i32, i32) {
    %c0_i32 = arith.constant 0 : i32
    %c0_i32_0 = arith.constant 0 : i32
    %c0_i32_1 = arith.constant 0 : i32
    return %arg0, %c0_i32, %c0_i32_0 : i32, i32, i32
  }
}

</mosaic_0001>

<bundles_post_ra>
// kernel: quant_ahpc_forward.1
= control target key start
LH: loop header
LB: loop body
LE: loop exit
PB: predicated region body
PF: predicated region fallthrough
CT: control target
= control target key end

     0   :  { %11 = vsyncpa [#allocation9], 0  ;;  %s1316_s21 = smov 0   ;;  %s1599_s0 = inlined_call_operand.vmem [shape: f32[6], index: 0, kind: input, shape index: {}]   ;;  %s1600_s1 = inlined_call_operand.vmem [shape: bf16[64,16], index: 1, kind: input, shape index: {}]   ;;  %s1601_s2 = inlined_call_operand.vmem [shape: bf16[16,32], index: 2, kind: input, shape index: {}]   ;;  %s1602_s3 = inlined_call_operand.vmem [shape: bf16[32,32], index: 3, kind: input, shape index: {}]   ;;  %s1603_s4 = inlined_call_operand.vmem [shape: bf16[32,256], index: 4, kind: input, shape index: {}]   ;;  %s1604_s5 = inlined_call_operand.vmem [shape: bf16[32,32], index: 5, kind: input, shape index: {}]   ;;  %s1605_s6 = inlined_call_operand.vmem [shape: f32[8,8,8], index: 6, kind: output, shape index: {}]  }
   0x1 LB: > { %s1003_s22 = sadd.s32 4294967295, %s1276_s21   ;;  %p1005_p0 = scmp.ge.s32.totalorder %s1276_s21, 1  ;;  %s1276_s21 = sphi %s1316_s21, %s17_s21  }
   0x2   : > { %p179_p1 = scmp.lt.s32.totalorder %s1276_s21, 3  ;;  %p1006_p2 = scmp.ne.s32.totalorder %s1003_s22, 0 }
   0x3   : > { %s191_s25 = sshll.u32 %s1599_s0, 4  ;;  %p1238_p4 = scmp.eq.s32.totalorder %s1003_s22, 0  ;;  %s192_s25 = int_to_ptr.vmem [resolvable:$true] %s191_s25 }
   0x4   : > { %p180_p3 = pnand %p1005_p0, %p179_p1  ;;  %s1278_s26 = smov [#allocation8]  }
   0x6   : > { %p1234_p5 = pneg %p180_p3  ;;  %225 = sbr.rel (%p180_p3) target bundleno = 1391 (0x56f), region = 44 }
   0x8   : > { %p1235_p6 = pnand %p1238_p4, %p1234_p5 }
   0xa   : > { %1237 = dma.vmem_to_smem (!%p1235_p6), %s192_s25, 16, %s1278_s26, [#allocation9]  }
   0xb   : > { %1271 = dma.done.wait (%p1238_p4), [#allocation9], 16  }
   0xc   : > { %1273 = vsyncadd (%p1238_p4), [#allocation9], 4294967280 }
   0xd   : > { %232 = sfence }
   0xe   : > { %s1010_s27 = sshll.u32 %s1003_s22, 2  ;;  %s1327_s28 = sld [smem:[#allocation8]] }
   0xf   : > { %p258_p7 = scmp.lt.s32.totalorder %s1010_s27, 7  ;;  %s1329_s29 = sld [smem:[#allocation8 + $0x1]] }
  0x10   : > { %s1331_s30 = sld [smem:[#allocation8 + $0x2]] }
  0x11   : > { %s1607_s27 = smov (!%p258_p7, %s1010_s27), 7  ;;  %s1333_s7 = sld [smem:[#allocation8 + $0x3]] }
  0x12   : > { %s1011_s8 = sshll.u32 %s1607_s27, 2  ;;  %s1013_s9 = sshll.u32 %s1607_s27, 3 }
  0x13   : > { %s261_s12 = scalar_lea.vmem %s1600_s1, %s1011_s8  ;;  %s1341_s15 = scalar_lea.vmem %s1605_s6, %s1013_s9 }
  0x14   : > { %s1343_s16 = sld [smem:[#allocation8 + $0x4]]  ;;  %279 = sbr.rel (%p1006_p2) target bundleno = 31 (0x1f), region = 52 }
  0x15   : > { %s1345_s17 = sld [smem:[#allocation8 + $0x5]] }
  0x19   : > { %vm280_vm0 = vcmask 261120   ;;  %v1279_v0 = vmov 0.0   ;;  %vm284_vm1 = vcmask 64512  }
  0x1a   : > { %281 = vst.msk [vmem:[#allocation3] sm:$0xff] %vm280_vm0, %v1279_v0 }
  0x1b   : > { %282 = vst.msk [vmem:[#allocation4] sm:$0xff] %vm280_vm0, %v1279_v0 }
  0x1c   : > { %283 = vst.msk [vmem:[#allocation5] sm:$0xff] %vm280_vm0, %v1279_v0 }
  0x1d   : > { %286 = vst.msk [vmem:[#allocation7] sm:$0xff] %vm280_vm0, %v1279_v0 }
  0x1e   : > { %285 = vst.msk [vmem:[#allocation6] sm:$0xff] %vm284_vm1, %v1279_v0 }
  0x1f PF: > { %v1197_v1 = vld [vmem:[%s1601_s2] sm:$0xff]  ;;  %vm309_vm2 = vcmask 130048   ;;  %v1196_v3 = vld [vmem:[%s261_s12 + $0x8] sm:$0xff]  ;;  %vm335_vm3 = vcmask 261120   ;;  %v346_v8 = vstv %s1327_s28  ;;  %v1360_v12 = vstv %s1329_s29 }
  0x20   : > { %v1195_v2 = vld [vmem:[%s261_s12] sm:$0xff]  ;;  %323 = vmatpush.bf16.msra.mxu0 %v1197_v1  ;;  %v1199_v4 = vld [vmem:[%s1602_s3 + $0x8] sm:$0xff]  ;;  %v1280_v15 = vmov 0.0   ;;  %v1055_v32 = vld [vmem:[%s1603_s4 + $0x10] sm:$0xf]  ;;  %v1409_v47 = vstv %s1331_s30  ;;  %vm459_vm9 = vcmask 64512  }
  0x21   : > { %380 = vmatpush.bf16.msra.mxu1 %v1199_v4  ;;  %v1198_v5 = vld [vmem:[%s1602_s3] sm:$0xff]  ;;  %v1203_v33 = vld [vmem:[%s1603_s4 + $0x14] sm:$0xf0]  ;;  %v1202_v34 = vld [vmem:[%s1603_s4 + $0x14] sm:$0xf]  ;;  %v1413_v55 = vstv %s1333_s7 }
  0x22   : > { %v340_v7 = vld [vmem:[#allocation3] sm:$0xff]  ;;  %v1056_v35 = vor.u32 %v1203_v33, %v1055_v32  ;;  %v1057_v36 = vld [vmem:[%s1603_s4 + $0x18] sm:$0xf0]  ;;  %v1201_v39 = vld [vmem:[%s1603_s4 + $0x4] sm:$0xf0] }
  0x23   : > { %1032 = vmatmul.msk.bf16.vlgmr.msra.gmra.mxu0 %vm309_vm2, %v1195_v2  ;;  %v347_v9 = vmul.f32 %v346_v8, %v340_v7  ;;  %v1060_v37 = vor.u32 %v1202_v34, %v1057_v36  ;;  %v1047_v38 = vld [vmem:[%s1603_s4] sm:$0xf]  ;;  %v1200_v40 = vld [vmem:[%s1603_s4 + $0x4] sm:$0xf]  ;;  %v1049_v42 = vld [vmem:[%s1603_s4 + $0x8] sm:$0xf0] }
  0x24   : > { %431 = vmatpush.bf16.msra.mxu2 %v1056_v35  ;;  %v1048_v41 = vor.u32 %v1201_v39, %v1047_v38  ;;  %v1052_v43 = vor.u32 %v1200_v40, %v1049_v42  ;;  %v1207_v44 = vld [vmem:[%s1602_s3 + $0x8] sm:$0xff]  ;;  %v1206_v45 = vld [vmem:[%s1602_s3] sm:$0xff]  ;;  %v342_v49 = vld [vmem:[#allocation5] sm:$0xff] }
  0x25   : > { %381 = vmatpush.bf16.msra.mxu1 %v1198_v5  ;;  %444 = vmatpush.bf16.msra.mxu3 %v1060_v37  ;;  %v341_v46 = vld [vmem:[#allocation4] sm:$0xff]  ;;  %v344_v50 = vld [vmem:[#allocation7] sm:$0xff]  ;;  %v391_v53 = vsub.f32 1.0, %v342_v49  ;;  %v1210_v33 = vld [vmem:[%s1603_s4 + $0x14] sm:$0xf] }
  0x26   : > { %v388_v48 = vmul.f32 %v1409_v47, %v341_v46  ;;  %v1215_v59 = vld [vmem:[%s1602_s3 + $0x8] sm:$0xff]  ;;  %v1214_v61 = vld [vmem:[%s1602_s3] sm:$0xff]  ;;  %v1096_v34 = vld [vmem:[%s1603_s4 + $0x18] sm:$0xf0] }
  0x27   : > { %v1223_v63 = vld [vmem:[%s1602_s3 + $0x8] sm:$0xff]  ;;  %v1222_v2 = vld [vmem:[%s1602_s3] sm:$0xff]  ;;  %v1099_v35 = vor.u32 %v1210_v33, %v1096_v34 }
  0x28   : > { %432 = vmatpush.bf16.msra.mxu2 %v1048_v41  ;;  %v1205_v1 = vld [vmem:[%s1604_s5 + $0x8] sm:$0xff]  ;;  %v1086_v36 = vld [vmem:[%s1603_s4] sm:$0xf]  ;;  %v1208_v38 = vld [vmem:[%s1603_s4 + $0x4] sm:$0xf] }
  0x29   : > { %445 = vmatpush.bf16.msra.mxu3 %v1052_v43  ;;  %488 = vmatpush.bf16.msrb.mxu1 %v1205_v1  ;;  %v1209_v37 = vld [vmem:[%s1603_s4 + $0x4] sm:$0xf0]  ;;  %v1088_v40 = vld [vmem:[%s1603_s4 + $0x8] sm:$0xf0] }
  0x2a   : > { %591 = vmatpush.bf16.msrb.mxu0 %v1099_v35  ;;  %v1087_v39 = vor.u32 %v1209_v37, %v1086_v36  ;;  %v1091_v41 = vor.u32 %v1208_v38, %v1088_v40  ;;  %v1213_v42 = vld [vmem:[%s1604_s5 + $0x8] sm:$0xff]  ;;  %v1176_v40 = vld [vmem:[%s1603_s4 + $0x18] sm:$0xf0] }
  0x2c   : > { %529 = vmatpush.bf16.msrb.mxu2 %v1207_v44 }
  0x2e   : > { %592 = vmatpush.bf16.msrb.mxu0 %v1091_v41 }
  0x30   : > { %530 = vmatpush.bf16.msrb.mxu2 %v1206_v45 }
  0x33   : > { %1033 = vmatmul.msk.bf16.gmra.mxu0 %vm309_vm2, %v1196_v3  ;;  %v1204_v3 = vld [vmem:[%s1604_s5] sm:$0xff] }
  0x34   : > { %489 = vmatpush.bf16.msrb.mxu1 %v1204_v3  ;;  %v1136_v3 = vld [vmem:[%s1603_s4 + $0x18] sm:$0xf0] }
  0xa0   : > { %v325_v6 = vpop.f32.mrf.mxu0 }
  0xa1   : > { %336 = vst.msk [vmem:[#allocation2] sm:$0xff] %vm335_vm3, %v325_v6 }
  0xa8   : > { %v327_v10 = vpop.f32.mrf.mxu0  ;;  %v345_v11 = vld [vmem:[#allocation2] sm:$0xff] }
  0xa9   : > { %337 = vst.msk [vmem:[#allocation2 + $0x8] sm:$0xff] %vm335_vm3, %v327_v10  ;;  %v348_v13 = vadd.f32 %v347_v9, %v345_v11  ;;  %v1454_v9 = vstv %s1343_s16 }
  0xab   : > { %vm350_vm4 = vcmp.gt.f32.partialorder %v348_v13, %v1360_v12 }
  0xac   : > { %v351_v14 = vsel %vm350_vm4, 0.0, %v348_v13  ;;  %v1034_v16 = vsel %vm350_vm4, 1.0, %v1280_v15 }
  0xad   : > { %v354_v17 = vpack.c.bf16 %v1034_v16, %v1034_v16  ;;  %v497_v18 = vmul.f32 %v351_v14, %v346_v8  ;;  %v1458_v14 = vstv %s1345_s17 }
  0xaf   : > { %1043 = vmatmul.msk.bf16.vlgmr.msra.gmra.mxu1 %vm335_vm3, %v354_v17 }
  0xb0   : > { %v496_v19 = vld [vmem:[#allocation2 + $0x8] sm:$0xff]  ;;  %v330_v20 = vpop.f32.mrf.mxu0  ;;  %633 = vmatpush.bf16.msra.mxu1 %v1213_v42  ;;  %v1166_v42 = vld [vmem:[%s1603_s4] sm:$0xf] }
  0xb1   : > { %v498_v21 = vadd.f32 %v497_v18, %v496_v19  ;;  %338 = vst.msk [vmem:[#allocation2 + $0x10] sm:$0xff] %vm335_vm3, %v330_v20 }
  0xb3   : > { %vm499_vm5 = vcmp.gt.f32.partialorder %v498_v21, %v1360_v12 }
  0xb4   : > { %v500_v22 = vsel %vm499_vm5, 0.0, %v498_v21  ;;  %v1073_v62 = vsel %vm499_vm5, 1.0, %v1280_v15 }
  0xb5   : > { %v642_v23 = vmul.f32 %v500_v22, %v346_v8  ;;  %v503_v0 = vpack.c.bf16 %v1073_v62, %v1073_v62 }
  0xb8   : > { %v332_v24 = vpop.f32.mrf.mxu0  ;;  %v641_v25 = vld [vmem:[#allocation2 + $0x10] sm:$0xff] }
  0xb9   : > { %339 = vst.msk [vmem:[#allocation2 + $0x18] sm:$0xff] %vm335_vm3, %v332_v24  ;;  %v643_v26 = vadd.f32 %v642_v23, %v641_v25 }
  0xbb   : > { %vm644_vm6 = vcmp.gt.f32.partialorder %v643_v26, %v1360_v12 }
  0xbc   : > { %v645_v27 = vsel %vm644_vm6, 0.0, %v643_v26  ;;  %v1113_v4 = vsel %vm644_vm6, 1.0, %v1280_v15  ;;  %v1094_v26 = vld [vmem:[%s1603_s4 + $0x10] sm:$0xf] }
  0xbd   : > { %v787_v28 = vmul.f32 %v645_v27, %v346_v8  ;;  %v648_v5 = vpack.c.bf16 %v1113_v4, %v1113_v4  ;;  %v343_v8 = vld [vmem:[#allocation6] sm:$0xff] }
  0xbe   : > { %v452_v10 = vmul.f32 %v1454_v9, %v343_v8  ;;  %v1211_v27 = vld [vmem:[%s1603_s4 + $0x14] sm:$0xf0] }
  0xc0   : > { %v786_v29 = vld [vmem:[#allocation2 + $0x18] sm:$0xff] }
  0xc1   : > { %v788_v30 = vadd.f32 %v787_v28, %v786_v29  ;;  %v1095_v28 = vor.u32 %v1211_v27, %v1094_v26  ;;  %v1227_v26 = vld [vmem:[%s1603_s4 + $0x14] sm:$0xf0] }
  0xc3   : > { %vm789_vm7 = vcmp.gt.f32.partialorder %v788_v30, %v1360_v12  ;;  %578 = vmatpush.bf16.msrb.mxu3 %v1095_v28 }
  0xc4   : > { %v790_v31 = vsel %vm789_vm7, 0.0, %v788_v30  ;;  %v1153_v6 = vsel %vm789_vm7, 1.0, %v1280_v15 }
  0xc5   : > { %930 = vst.msk [vmem:[#allocation3] sm:$0xff] %vm335_vm3, %v790_v31  ;;  %v793_v7 = vpack.c.bf16 %v1153_v6, %v1153_v6  ;;  %v1217_v6 = vld [vmem:[%s1603_s4 + $0x4] sm:$0xf0] }
  0xc7   : > { %579 = vmatpush.bf16.msrb.mxu3 %v1087_v39  ;;  %v1226_v39 = vld [vmem:[%s1603_s4 + $0x14] sm:$0xf] }
  0xc8   : > { %v1179_v41 = vor.u32 %v1226_v39, %v1176_v40 }
 0x12c   : > { %v383_v51 = vpop.f32.mrf.mxu1 }
 0x12d   : > { %v389_v52 = vadd.f32 %v388_v48, %v383_v51  ;;  %v1212_v51 = vld [vmem:[%s1604_s5] sm:$0xff] }
 0x12e   : > { %634 = vmatpush.bf16.msra.mxu1 %v1212_v51 }
 0x12f   : > { %v390_v54 = vadd.f32 %v389_v52, %v344_v50  ;;  %v1134_v52 = vld [vmem:[%s1603_s4 + $0x10] sm:$0xf] }
 0x131   : > { %v392_v56 = vmul.f32 %v391_v53, %v390_v54  ;;  %v1219_v53 = vld [vmem:[%s1603_s4 + $0x14] sm:$0xf0] }
 0x132   : > { %v1135_v54 = vor.u32 %v1219_v53, %v1134_v52 }
 0x133   : > { %vm394_vm8 = vcmp.gt.f32.partialorder %v392_v56, %v1413_v55  ;;  %v536_v22 = vmul.f32 %v392_v56, %v1409_v47 }
 0x134   : > { %v385_v57 = vpop.f32.mrf.mxu1  ;;  %v1417_v58 = vsel %vm394_vm8, 1.0, %v1280_v15 }
 0x135   : > { %v397_v60 = vpack.c.bf16 %v1417_v58, %v1417_v58  ;;  %v539_v45 = vsub.f32 1.0, %v1417_v58 }
 0x137   : > { %1061 = vmatmul.msk.bf16.vlgmr.msra.gmra.mxu2 %vm335_vm3, %v397_v60  ;;  %1062 = vmatmul.msk.bf16.vlgmr.msra.gmra.mxu3 %vm335_vm3, %v397_v60 }
 0x138   : > { %674 = vmatpush.bf16.msra.mxu2 %v1215_v59  ;;  %723 = vmatpush.bf16.msra.mxu3 %v1135_v54 }
 0x13c   : > { %675 = vmatpush.bf16.msra.mxu2 %v1214_v61 }
 0x147   : > { %1082 = vmatmul.msk.bf16.vlgmr.msrb.gmra.mxu2 %vm335_vm3, %v503_v0 }
 0x148   : > { %819 = vmatpush.bf16.msrb.mxu2 %v1223_v63 }
 0x14c   : > { %820 = vmatpush.bf16.msrb.mxu2 %v1222_v2  ;;  %v1218_v2 = vld [vmem:[%s1603_s4 + $0x14] sm:$0xf] }
 0x14d   : > { %v1139_v4 = vor.u32 %v1218_v2, %v1136_v3 }
 0x14f   : > { %736 = vmatpush.bf16.msra.mxu0 %v1139_v4 }
 0x157   : > { %1122 = vmatmul.msk.bf16.vlgmr.msra.gmra.mxu2 %vm335_vm3, %v648_v5  ;;  %v1126_v5 = vld [vmem:[%s1603_s4] sm:$0xf] }
 0x158   : > { %v1127_v8 = vor.u32 %v1217_v6, %v1126_v5 }
 0x15a   : > { %724 = vmatpush.bf16.msra.mxu3 %v1127_v8 }
 0x167   : > { %1162 = vmatmul.msk.bf16.vlgmr.msrb.gmra.mxu2 %vm335_vm3, %v793_v7  ;;  %v1216_v7 = vld [vmem:[%s1603_s4 + $0x4] sm:$0xf] }
 0x1ba   : > { %v434_v11 = vpop.f32.mrf.mxu2  ;;  %v447_v13 = vpop.f32.mrf.mxu3 }
 0x1bb   : > { %v461_v16 = vmax.f32 %v434_v11, 0.0  ;;  %v453_v17 = vadd.f32 %v452_v10, %v447_v13  ;;  %v1128_v10 = vld [vmem:[%s1603_s4 + $0x8] sm:$0xf0] }
 0x1bc   : > { %v1131_v11 = vor.u32 %v1216_v7, %v1128_v10  ;;  %v1221_v13 = vld [vmem:[%s1604_s5 + $0x8] sm:$0xff] }
 0x1bd   : > { %v462_v18 = vpack.c.bf16 %v461_v16, %v461_v16  ;;  %vm455_vm10 = vcmp.gt.f32.partialorder %v453_v17, %v1458_v14 }
 0x1be   : > { %v456_v12 = vsel %vm455_vm10, 0.0, %v453_v17  ;;  %v1063_v19 = vsel %vm455_vm10, 1.0, %v1280_v15  ;;  %737 = vmatpush.bf16.msra.mxu0 %v1131_v11 }
 0x1bf   : > { %460 = vst.msk [vmem:[%s1341_s15] sm:$0xff] %vm459_vm9, %v1063_v19  ;;  %1072 = vmatmul.msk.bf16.vlgmr.msrb.gmra.mxu1 %vm335_vm3, %v462_v18  ;;  %v598_v56 = vmul.f32 %v456_v12, %v1454_v9 }
 0x1c0   : > { %778 = vmatpush.bf16.msrb.mxu1 %v1221_v13 }
 0x1c2   : > { %v436_v20 = vpop.f32.mrf.mxu2  ;;  %v449_v21 = vpop.f32.mrf.mxu3 }
 0x1ca   : > { %v532_v23 = vpop.f32.mrf.mxu2 }
 0x1cb   : > { %v537_v24 = vadd.f32 %v536_v22, %v532_v23 }
 0x1d2   : > { %v534_v25 = vpop.f32.mrf.mxu2 }
 0x1d3   : > { %v1174_v25 = vld [vmem:[%s1603_s4 + $0x10] sm:$0xf] }
 0x1d4   : > { %v1175_v27 = vor.u32 %v1227_v26, %v1174_v25 }
 0x1da   : > { %v677_v29 = vpop.f32.mrf.mxu2 }
 0x1e2   : > { %v679_v30 = vpop.f32.mrf.mxu2 }
 0x1ea   : > { %v1472_v31 = vpop.f32.mrf.mxu2 }
 0x1f2   : > { %v824_v32 = vpop.f32.mrf.mxu2 }
 0x23c   : > { %v491_v43 = vpop.f32.mrf.mxu1 }
 0x23d   : > { %v538_v44 = vadd.f32 %v537_v24, %v491_v43  ;;  %v1220_v24 = vld [vmem:[%s1604_s5] sm:$0xff]  ;;  %v1225_v43 = vld [vmem:[%s1603_s4 + $0x4] sm:$0xf0] }
 0x23e   : > { %779 = vmatpush.bf16.msrb.mxu1 %v1220_v24 }
 0x23f   : > { %v540_v46 = vmul.f32 %v539_v45, %v538_v44  ;;  %v1224_v44 = vld [vmem:[%s1603_s4 + $0x4] sm:$0xf]  ;;  %v1167_v45 = vor.u32 %v1225_v43, %v1166_v42 }
 0x241   : > { %vm541_vm11 = vcmp.gt.f32.partialorder %v540_v46, %v1413_v55  ;;  %v681_v16 = vmul.f32 %v540_v46, %v1409_v47  ;;  %v1168_v46 = vld [vmem:[%s1603_s4 + $0x8] sm:$0xf0] }
 0x242   : > { %v1083_v48 = vsel %vm541_vm11, 1.0, %v1280_v15 }
 0x243   : > { %v544_v49 = vpack.c.bf16 %v1083_v48, %v1083_v48  ;;  %v682_v17 = vadd.f32 %v681_v16, %v677_v29  ;;  %v684_v19 = vsub.f32 1.0, %v1083_v48  ;;  %v1171_v48 = vor.u32 %v1224_v44, %v1168_v46 }
 0x244   : > { %v493_v50 = vpop.f32.mrf.mxu1 }
 0x245   : > { %1100 = vmatmul.msk.bf16.vlgmr.msrb.gmra.mxu3 %vm335_vm3, %v544_v49  ;;  %1101 = vmatmul.msk.bf16.vlgmr.msrb.gmra.mxu0 %vm335_vm3, %v544_v49  ;;  %v1229_v49 = vld [vmem:[%s1604_s5 + $0x8] sm:$0xff] }
 0x246   : > { %868 = vmatpush.bf16.msrb.mxu3 %v1175_v27  ;;  %881 = vmatpush.bf16.msrb.mxu0 %v1179_v41 }
 0x24a   : > { %869 = vmatpush.bf16.msrb.mxu3 %v1167_v45  ;;  %882 = vmatpush.bf16.msrb.mxu0 %v1171_v48 }
 0x2c2   : > { %v594_v57 = vpop.f32.mrf.mxu0 }
 0x2c3   : > { %v599_v58 = vadd.f32 %v598_v56, %v594_v57 }
 0x2c5   : > { %vm600_vm12 = vcmp.gt.f32.partialorder %v599_v58, %v1458_v14 }
 0x2c6   : > { %v601_v59 = vsel %vm600_vm12, 0.0, %v599_v58  ;;  %v1102_v60 = vsel %vm600_vm12, 1.0, %v1280_v15 }
 0x2c7   : > { %1103 = vst.msk [vmem:[%s1341_s15 + $0x8] sm:$0xff] %vm459_vm9, %v1102_v60  ;;  %v743_v28 = vmul.f32 %v601_v59, %v1454_v9 }
 0x2c8   : > { %v581_v61 = vpop.f32.mrf.mxu3 }
 0x2c9   : > { %v606_v62 = vmax.f32 %v581_v61, 0.0 }
 0x2ca   : > { %v596_v63 = vpop.f32.mrf.mxu0 }
 0x2cb   : > { %v607_v0 = vpack.c.bf16 %v606_v62, %v606_v62 }
 0x2cd   : > { %1112 = vmatmul.msk.bf16.vlgmr.msra.gmra.mxu1 %vm335_vm3, %v607_v0 }
 0x2ce   : > { %923 = vmatpush.bf16.msra.mxu1 %v1229_v49 }
 0x2d0   : > { %v583_v1 = vpop.f32.mrf.mxu3 }
 0x34a   : > { %v636_v18 = vpop.f32.mrf.mxu1 }
 0x34b   : > { %v683_v12 = vadd.f32 %v682_v17, %v636_v18 }
 0x34d   : > { %v685_v20 = vmul.f32 %v684_v19, %v683_v12 }
 0x34f   : > { %vm686_vm13 = vcmp.gt.f32.partialorder %v685_v20, %v1413_v55  ;;  %v826_v50 = vmul.f32 %v685_v20, %v1409_v47  ;;  %v1228_v47 = vld [vmem:[%s1604_s5] sm:$0xff] }
 0x350   : > { %v1123_v21 = vsel %vm686_vm13, 1.0, %v1280_v15  ;;  %924 = vmatpush.bf16.msra.mxu1 %v1228_v47 }
 0x351   : > { %v689_v22 = vpack.c.bf16 %v1123_v21, %v1123_v21  ;;  %v827_v51 = vadd.f32 %v826_v50, %v1472_v31  ;;  %v829_v54 = vsub.f32 1.0, %v1123_v21 }
 0x352   : > { %v638_v23 = vpop.f32.mrf.mxu1 }
 0x353   : > { %1140 = vmatmul.msk.bf16.vlgmr.msra.gmra.mxu3 %vm335_vm3, %v689_v22  ;;  %1141 = vmatmul.msk.bf16.vlgmr.msra.gmra.mxu0 %vm335_vm3, %v689_v22 }
 0x3d0   : > { %v739_v29 = vpop.f32.mrf.mxu0 }
 0x3d1   : > { %v744_v30 = vadd.f32 %v743_v28, %v739_v29 }
 0x3d3   : > { %vm745_vm14 = vcmp.gt.f32.partialorder %v744_v30, %v1458_v14 }
 0x3d4   : > { %v746_v32 = vsel %vm745_vm14, 0.0, %v744_v30  ;;  %v1142_v33 = vsel %vm745_vm14, 1.0, %v1280_v15 }
 0x3d5   : > { %1143 = vst.msk [vmem:[%s1341_s15 + $0x10] sm:$0xff] %vm459_vm9, %v1142_v33 }
 0x3d6   : > { %v726_v34 = vpop.f32.mrf.mxu3 }
 0x3d7   : > { %v751_v35 = vmax.f32 %v726_v34, 0.0 }
 0x3d8   : > { %v741_v36 = vpop.f32.mrf.mxu0 }
 0x3d9   : > { %v752_v37 = vpack.c.bf16 %v751_v35, %v751_v35 }
 0x3db   : > { %1152 = vmatmul.msk.bf16.vlgmr.msrb.gmra.mxu1 %vm335_vm3, %v752_v37 }
 0x3de   : > { %v728_v38 = vpop.f32.mrf.mxu3 }
 0x458   : > { %v781_v52 = vpop.f32.mrf.mxu1 }
 0x459   : > { %v828_v53 = vadd.f32 %v827_v51, %v781_v52 }
 0x45b   : > { %v830_v56 = vmul.f32 %v829_v54, %v828_v53 }
 0x45d   : > { %vm831_vm15 = vcmp.gt.f32.partialorder %v830_v56, %v1413_v55  ;;  %931 = vst.msk [vmem:[#allocation4] sm:$0xff] %vm335_vm3, %v830_v56  ;;  %v888_v55 = vmul.f32 %v746_v32, %v1454_v9 }
 0x45e   : > { %v1163_v57 = vsel %vm831_vm15, 1.0, %v1280_v15 }
 0x45f   : > { %v834_v58 = vpack.c.bf16 %v1163_v57, %v1163_v57  ;;  %932 = vst.msk [vmem:[#allocation5] sm:$0xff] %vm335_vm3, %v1163_v57 }
 0x460   : > { %v783_v59 = vpop.f32.mrf.mxu1 }
 0x461   : > { %1180 = vmatmul.msk.bf16.vlgmr.msrb.gmra.mxu3 %vm335_vm3, %v834_v58  ;;  %1181 = vmatmul.msk.bf16.vlgmr.msrb.gmra.mxu0 %vm335_vm3, %v834_v58 }
 0x4de   : > { %v884_v31 = vpop.f32.mrf.mxu0 }
 0x4df   : > { %v889_v60 = vadd.f32 %v888_v55, %v884_v31 }
 0x4e1   : > { %vm890_vm0 = vcmp.gt.f32.partialorder %v889_v60, %v1458_v14 }
 0x4e2   : > { %v891_v61 = vsel %vm890_vm0, 0.0, %v889_v60  ;;  %v1182_v62 = vsel %vm890_vm0, 1.0, %v1280_v15 }
 0x4e3   : > { %1183 = vst.msk [vmem:[%s1341_s15 + $0x18] sm:$0xff] %vm459_vm9, %v1182_v62 }
 0x4e4   : > { %933 = vst.msk [vmem:[#allocation6] sm:$0xff] %vm459_vm9, %v891_v61  ;;  %v871_v63 = vpop.f32.mrf.mxu3 }
 0x4e5   : > { %v896_v0 = vmax.f32 %v871_v63, 0.0 }
 0x4e6   : > { %v886_v1 = vpop.f32.mrf.mxu0 }
 0x4e7   : > { %v897_v2 = vpack.c.bf16 %v896_v0, %v896_v0 }
 0x4e9   : > { %1192 = vmatmul.msk.bf16.vlgmr.msra.gmra.mxu1 %vm335_vm3, %v897_v2 }
 0x4ec   : > { %v873_v3 = vpop.f32.mrf.mxu3 }
 0x566   : > { %v926_v4 = vpop.f32.mrf.mxu1 }
 0x567   : > { %934 = vst.msk [vmem:[#allocation7] sm:$0xff] %vm335_vm3, %v926_v4 }
 0x56e   : > { %v928_v9 = vpop.f32.mrf.mxu1 }
 0x56f PF: > { %s17_s21 = sadd.s32 1, %s1276_s21  }
 0x570   : > { %p14_p8 = scmp.ge.s32.totalorder %s17_s21, 4  }
 0x572   :  { %16 = sbr.rel (!%p14_p8) target bundleno = 1 (0x1), region = 89 }
 0x577   :  { %957 = vsyncpa [#allocation9], 1 }
 0x578   :  { %959 = vsyncpa [#allocation9 + $0x1], 1 }

</bundles_post_ra>
